<compile_context>
chip_gen: v7x
topology: tpu7x:2x2x1
jax: 0.10.0
libtpu: 0.0.40
codegen_flags: <defaults>
</compile_context>

<pallas_src>
import functools

import jax
import jax.numpy as jnp
from jax.experimental import pallas as pl
from jax.experimental.pallas import tpu as pltpu

_LANE = 128
_NEG = -1e30


def _round_up(n, m):
    return (n + m - 1) // m * m


def fc_network_kernel(x_ref, w1_ref, b1_ref, w2_ref, b2_ref, w3_ref, b3_ref,
                      out_ref):
    """Fused forward: 3 matmuls (bf16 x bf16 -> f32 acc) + ReLUs + softmax."""
    x = x_ref[...].astype(jnp.bfloat16)

    # Layer 1: Linear + ReLU   (Dropout(p=0) is identity)
    h1 = jnp.dot(x, w1_ref[...], preferred_element_type=jnp.float32) + b1_ref[...]
    h1 = jnp.maximum(h1, 0.0)

    # Layer 2: Linear + ReLU (+ the extra ReLU in the Sequential — idempotent)
    h2 = jnp.dot(h1.astype(jnp.bfloat16), w2_ref[...],
                 preferred_element_type=jnp.float32) + b2_ref[...]
    h2 = jnp.maximum(h2, 0.0)

    # Output layer: Linear.  1/temperature is pre-folded into w3/b3; padded
    # output columns carry a -1e30 bias so they vanish from the softmax.
    logits = jnp.dot(h2.astype(jnp.bfloat16), w3_ref[...],
                     preferred_element_type=jnp.float32) + b3_ref[...]

    # Numerically stable softmax over dim=1; reciprocal goes to the EUP.
    m = jnp.max(logits, axis=1, keepdims=True)
    e = jnp.exp(logits - m)
    denom = jnp.sum(e, axis=1, keepdims=True)
    out_ref[...] = (e * pl.reciprocal(denom, approx=True)).astype(out_ref.dtype)


def make_params(key, dim_input, dim_hidden, dim_output):
    """Deterministic synthetic parameters (PyTorch-style (out,in) -> (in,out))."""
    ks = jax.random.split(key, 6)
    s1 = 1.0 / jnp.sqrt(dim_input)
    s2 = 1.0 / jnp.sqrt(dim_hidden)
    w1 = jax.random.uniform(ks[0], (dim_input, dim_hidden), jnp.float32, -s1, s1)
    b1 = jax.random.uniform(ks[1], (1, dim_hidden), jnp.float32, -s1, s1)
    w2 = jax.random.uniform(ks[2], (dim_hidden, dim_hidden), jnp.float32, -s2, s2)
    b2 = jax.random.uniform(ks[3], (1, dim_hidden), jnp.float32, -s2, s2)
    w3 = jax.random.uniform(ks[4], (dim_hidden, dim_output), jnp.float32, -s2, s2)
    b3 = jax.random.uniform(ks[5], (1, dim_output), jnp.float32, -s2, s2)
    return (w1, b1, w2, b2, w3, b3)


def prepare_params(params, distillation_temperature):
    """f32 PyTorch-semantics params -> kernel params.

    * hidden / output feature dims zero-padded to multiples of 128 (lane-dense)
    * 1/temperature folded into the last Linear
    * padded logit columns biased to -1e30 so softmax ignores them
    * weights cast to bf16 for the MXU; biases stay f32
    """
    w1, b1, w2, b2, w3, b3 = params
    d_in, d_h = w1.shape
    d_out = w3.shape[1]
    d_hp = _round_up(d_h, _LANE)
    d_op = _round_up(d_out, _LANE)
    inv_t = 1.0 / float(distillation_temperature)

    w1p = jnp.zeros((d_in, d_hp), jnp.float32).at[:, :d_h].set(w1)
    b1p = jnp.zeros((1, d_hp), jnp.float32).at[:, :d_h].set(b1)
    w2p = jnp.zeros((d_hp, d_hp), jnp.float32).at[:d_h, :d_h].set(w2)
    b2p = jnp.zeros((1, d_hp), jnp.float32).at[:, :d_h].set(b2)
    w3p = jnp.zeros((d_hp, d_op), jnp.float32).at[:d_h, :d_out].set(w3 * inv_t)
    b3p = jnp.full((1, d_op), _NEG, jnp.float32).at[:, :d_out].set(b3 * inv_t)

    return (w1p.astype(jnp.bfloat16), b1p,
            w2p.astype(jnp.bfloat16), b2p,
            w3p.astype(jnp.bfloat16), b3p)


@functools.partial(jax.jit, static_argnames=("dim_output", "block_rows"))
def fc_network_forward(x, kernel_params, *, dim_output, block_rows=256):
    w1, b1, w2, b2, w3, b3 = kernel_params
    B, d_in = x.shape
    d_op = w3.shape[1]

    # Batch tile: fill the MXU M-dim (256 rows on v6e/v7x) when the batch
    # allows; otherwise round up to a sublane multiple and run one grid step.
    tb = min(block_rows, _round_up(B, 8))
    b_pad = _round_up(B, tb)
    if b_pad != B:
        x = jnp.pad(x, ((0, b_pad - B), (0, 0)))

    resident = lambda a: pl.BlockSpec(a.shape, lambda i: (0,) * a.ndim)

    out = pl.pallas_call(
        fc_network_kernel,
        out_shape=jax.ShapeDtypeStruct((b_pad, d_op), jnp.float32),
        grid=(b_pad // tb,),
        in_specs=[
            # Streamed activation tile (double-buffered by the pipeline; bump
            # to pipeline_mode=pl.Buffered(3) if DMA ever shows as exposed).
            pl.BlockSpec((tb, d_in), lambda i: (i, 0)),
            resident(w1), resident(b1),
            resident(w2), resident(b2),
            resident(w3), resident(b3),
        ],
        out_specs=pl.BlockSpec((tb, d_op), lambda i: (i, 0)),
        compiler_params=pltpu.CompilerParams(
            dimension_semantics=("parallel",)),
    )(x, w1, b1, w2, b2, w3, b3)

    # Drop batch / output-lane padding outside the kernel.
    return out[:B, :dim_output]


if __name__ == "__main__":
    # Small MNIST-distillation-like shapes.
    batch, dim_input, dim_hidden, dim_output = 32, 64, 32, 10
    distillation_temperature = 2.0

    key = jax.random.PRNGKey(0)
    k_x, k_p = jax.random.split(key)
    x = jax.random.normal(k_x, (batch, dim_input), dtype=jnp.float32)
    params = make_params(k_p, dim_input, dim_hidden, dim_output)
    kparams = prepare_params(params, distillation_temperature)

    out = fc_network_forward(x, kparams, dim_output=dim_output)
    out = jax.block_until_ready(out)

    # Reference (PyTorch semantics) in plain f32 JAX.
    w1, b1, w2, b2, w3, b3 = params
    h1 = jnp.maximum(x @ w1 + b1, 0.0)
    h2 = jnp.maximum(h1 @ w2 + b2, 0.0)
    logits = (h2 @ w3 + b3) / distillation_temperature
    ref = jax.nn.softmax(logits, axis=1)

    assert out.shape == (batch, dim_output)
    # bf16 matmul operands + approx reciprocal -> slightly relaxed tolerance
    # versus the all-f32 reference.
    assert jnp.allclose(out, ref, atol=1e-2, rtol=1e-2)
    assert jnp.allclose(jnp.sum(out, axis=1), 1.0, atol=5e-3)

    print("KERNEL_OK")
</pallas_src>

<mosaic_0001>
module attributes {stable_mosaic.version = 11 : i64} {
  func.func @fc_network_kernel(%arg0: i32, %arg1: memref<32x64xf32, #tpu.memory_space<vmem>>, %arg2: memref<64x128xbf16, #tpu.memory_space<vmem>>, %arg3: memref<1x128xf32, #tpu.memory_space<vmem>>, %arg4: memref<128x128xbf16, #tpu.memory_space<vmem>>, %arg5: memref<1x128xf32, #tpu.memory_space<vmem>>, %arg6: memref<128x128xbf16, #tpu.memory_space<vmem>>, %arg7: memref<1x128xf32, #tpu.memory_space<vmem>>, %arg8: memref<32x128xf32, #tpu.memory_space<vmem>>) attributes {dimension_semantics = [#tpu.dimension_semantics<parallel>], iteration_bounds = array<i64: 1>, scalar_prefetch = 0 : i64, scratch_operands = 0 : i64, tpu.core_type = #tpu.core_type<tc>, window_params = [{transform_indices = @transform_0, window_bounds = array<i64: 32, 64>}, {pipeline_mode = #tpu.pipeline_mode<synchronous>, transform_indices = @transform_1, window_bounds = array<i64: 64, 128>}, {pipeline_mode = #tpu.pipeline_mode<synchronous>, transform_indices = @transform_2, window_bounds = array<i64: 1, 128>}, {pipeline_mode = #tpu.pipeline_mode<synchronous>, transform_indices = @transform_3, window_bounds = array<i64: 128, 128>}, {pipeline_mode = #tpu.pipeline_mode<synchronous>, transform_indices = @transform_4, window_bounds = array<i64: 1, 128>}, {pipeline_mode = #tpu.pipeline_mode<synchronous>, transform_indices = @transform_5, window_bounds = array<i64: 128, 128>}, {pipeline_mode = #tpu.pipeline_mode<synchronous>, transform_indices = @transform_6, window_bounds = array<i64: 1, 128>}, {transform_indices = @transform_7, window_bounds = array<i64: 32, 128>}]} {
    %c0 = arith.constant 0 : index
    %c0_0 = arith.constant 0 : index
    %0 = vector.load %arg1[%c0, %c0_0] : memref<32x64xf32, #tpu.memory_space<vmem>>, vector<32x64xf32>
    %1 = arith.truncf %0 : vector<32x64xf32> to vector<32x64xbf16>
    %c0_1 = arith.constant 0 : index
    %c0_2 = arith.constant 0 : index
    %2 = vector.load %arg2[%c0_1, %c0_2] : memref<64x128xbf16, #tpu.memory_space<vmem>>, vector<64x128xbf16>
    %cst = arith.constant dense<0.000000e+00> : vector<32x128xf32>
    %3 = tpu.matmul %1, %2, %cst {dimension_numbers = #tpu.dot_dimension_numbers<[1], [0], [0], [1], [0, 0, 1, 1], [], []>} : vector<32x64xbf16>, vector<64x128xbf16>, vector<32x128xf32> -> vector<32x128xf32>
    %c0_3 = arith.constant 0 : index
    %c0_4 = arith.constant 0 : index
    %4 = vector.load %arg3[%c0_3, %c0_4] : memref<1x128xf32, #tpu.memory_space<vmem>>, vector<1x128xf32>
    %5 = vector.broadcast %4 : vector<1x128xf32> to vector<32x128xf32>
    %6 = arith.addf %3, %5 : vector<32x128xf32>
    %cst_5 = arith.constant 0.000000e+00 : f32
    %7 = vector.broadcast %cst_5 : f32 to vector<32x128xf32>
    %8 = arith.maximumf %6, %7 : vector<32x128xf32>
    %9 = arith.truncf %8 : vector<32x128xf32> to vector<32x128xbf16>
    %c0_6 = arith.constant 0 : index
    %c0_7 = arith.constant 0 : index
    %10 = vector.load %arg4[%c0_6, %c0_7] : memref<128x128xbf16, #tpu.memory_space<vmem>>, vector<128x128xbf16>
    %cst_8 = arith.constant dense<0.000000e+00> : vector<32x128xf32>
    %11 = tpu.matmul %9, %10, %cst_8 {dimension_numbers = #tpu.dot_dimension_numbers<[1], [0], [0], [1], [0, 0, 1, 1], [], []>} : vector<32x128xbf16>, vector<128x128xbf16>, vector<32x128xf32> -> vector<32x128xf32>
    %c0_9 = arith.constant 0 : index
    %c0_10 = arith.constant 0 : index
    %12 = vector.load %arg5[%c0_9, %c0_10] : memref<1x128xf32, #tpu.memory_space<vmem>>, vector<1x128xf32>
    %13 = vector.broadcast %12 : vector<1x128xf32> to vector<32x128xf32>
    %14 = arith.addf %11, %13 : vector<32x128xf32>
    %cst_11 = arith.constant 0.000000e+00 : f32
    %15 = vector.broadcast %cst_11 : f32 to vector<32x128xf32>
    %16 = arith.maximumf %14, %15 : vector<32x128xf32>
    %17 = arith.truncf %16 : vector<32x128xf32> to vector<32x128xbf16>
    %c0_12 = arith.constant 0 : index
    %c0_13 = arith.constant 0 : index
    %18 = vector.load %arg6[%c0_12, %c0_13] : memref<128x128xbf16, #tpu.memory_space<vmem>>, vector<128x128xbf16>
    %cst_14 = arith.constant dense<0.000000e+00> : vector<32x128xf32>
    %19 = tpu.matmul %17, %18, %cst_14 {dimension_numbers = #tpu.dot_dimension_numbers<[1], [0], [0], [1], [0, 0, 1, 1], [], []>} : vector<32x128xbf16>, vector<128x128xbf16>, vector<32x128xf32> -> vector<32x128xf32>
    %c0_15 = arith.constant 0 : index
    %c0_16 = arith.constant 0 : index
    %20 = vector.load %arg7[%c0_15, %c0_16] : memref<1x128xf32, #tpu.memory_space<vmem>>, vector<1x128xf32>
    %21 = vector.broadcast %20 : vector<1x128xf32> to vector<32x128xf32>
    %22 = arith.addf %19, %21 : vector<32x128xf32>
    %cst_17 = arith.constant dense<0xFF800000> : vector<32xf32>
    %23 = vector.multi_reduction <maximumf>, %22, %cst_17 [1] : vector<32x128xf32> to vector<32xf32>
    %24 = vector.shape_cast %23 : vector<32xf32> to vector<32x1xf32>
    %25 = vector.broadcast %24 : vector<32x1xf32> to vector<32x128xf32>
    %26 = arith.subf %22, %25 : vector<32x128xf32>
    %27 = math.exp %26 : vector<32x128xf32>
    %cst_18 = arith.constant dense<0.000000e+00> : vector<32xf32>
    %28 = vector.multi_reduction <add>, %27, %cst_18 [1] : vector<32x128xf32> to vector<32xf32>
    %29 = vector.shape_cast %28 : vector<32xf32> to vector<32x1xf32>
    %30 = tpu.reciprocal %29 {approx = true} : vector<32x1xf32> -> vector<32x1xf32>
    %31 = vector.broadcast %30 : vector<32x1xf32> to vector<32x128xf32>
    %32 = arith.mulf %27, %31 : vector<32x128xf32>
    %c0_19 = arith.constant 0 : index
    %c0_20 = arith.constant 0 : index
    %33 = vector.load %arg8[%c0_19, %c0_20] : memref<32x128xf32, #tpu.memory_space<vmem>>, vector<32x128xf32>
    tpu.vector_store %arg8[%c0_19, %c0_20], %32 {strides = array<i32>} : memref<32x128xf32, #tpu.memory_space<vmem>>, vector<32x128xf32>,
    return
  }
  func.func @transform_0(%arg0: i32) -> (i32, i32) {
    %c0_i32 = arith.constant 0 : i32
    %c0_i32_0 = arith.constant 0 : i32
    return %arg0, %c0_i32 : i32, i32
  }
  func.func @transform_1(%arg0: i32) -> (i32, i32) {
    %c0_i32 = arith.constant 0 : i32
    %c0_i32_0 = arith.constant 0 : i32
    %c0_i32_1 = arith.constant 0 : i32
    return %c0_i32, %c0_i32_0 : i32, i32
  }
  func.func @transform_2(%arg0: i32) -> (i32, i32) {
    %c0_i32 = arith.constant 0 : i32
    %c0_i32_0 = arith.constant 0 : i32
    %c0_i32_1 = arith.constant 0 : i32
    return %c0_i32, %c0_i32_0 : i32, i32
  }
  func.func @transform_3(%arg0: i32) -> (i32, i32) {
    %c0_i32 = arith.constant 0 : i32
    %c0_i32_0 = arith.constant 0 : i32
    %c0_i32_1 = arith.constant 0 : i32
    return %c0_i32, %c0_i32_0 : i32, i32
  }
  func.func @transform_4(%arg0: i32) -> (i32, i32) {
    %c0_i32 = arith.constant 0 : i32
    %c0_i32_0 = arith.constant 0 : i32
    %c0_i32_1 = arith.constant 0 : i32
    return %c0_i32, %c0_i32_0 : i32, i32
  }
  func.func @transform_5(%arg0: i32) -> (i32, i32) {
    %c0_i32 = arith.constant 0 : i32
    %c0_i32_0 = arith.constant 0 : i32
    %c0_i32_1 = arith.constant 0 : i32
    return %c0_i32, %c0_i32_0 : i32, i32
  }
  func.func @transform_6(%arg0: i32) -> (i32, i32) {
    %c0_i32 = arith.constant 0 : i32
    %c0_i32_0 = arith.constant 0 : i32
    %c0_i32_1 = arith.constant 0 : i32
    return %c0_i32, %c0_i32_0 : i32, i32
  }
  func.func @transform_7(%arg0: i32) -> (i32, i32) {
    %c0_i32 = arith.constant 0 : i32
    %c0_i32_0 = arith.constant 0 : i32
    return %arg0, %c0_i32 : i32, i32
  }
}

</mosaic_0001>

<bundles_post_ra>
// kernel: fc_network_forward.1
= control target key start
LH: loop header
LB: loop body
LE: loop exit
PB: predicated region body
PF: predicated region fallthrough
CT: control target
= control target key end

     0   :  { %12 = vsyncpa [#allocation3], 0  ;;  %s858_s0 = inlined_call_operand.hbm [shape: f32[32,64], index: 0, kind: input, shape index: {}]   ;;  %s859_s1 = inlined_call_operand.hbm [shape: bf16[64,128], index: 1, kind: input, shape index: {}]   ;;  %s860_s2 = inlined_call_operand.vmem [shape: f32[1,128], index: 2, kind: input, shape index: {}]   ;;  %s861_s3 = inlined_call_operand.hbm [shape: bf16[128,128], index: 3, kind: input, shape index: {}]   ;;  %s862_s4 = inlined_call_operand.vmem [shape: f32[1,128], index: 4, kind: input, shape index: {}]   ;;  %s863_s5 = inlined_call_operand.hbm [shape: bf16[128,128], index: 5, kind: input, shape index: {}]   ;;  %s864_s6 = inlined_call_operand.vmem [shape: f32[1,128], index: 6, kind: input, shape index: {}]   ;;  %s865_s7 = inlined_call_operand.vmem [shape: f32[32,128], index: 7, kind: output, shape index: {}]  }
   0x1   :  { %13 = vsyncpa [#allocation5], 0 }
   0x2   :  { %14 = vsyncpa [#allocation8], 0  ;;  %s723_s24 = smov [#allocation4]   ;;  %s629_s28 = scalar_lea.hbm %s859_s1, 512 }
   0x3   :  { %s32_s25 = sshll.u32 %s723_s24, 4  ;;  %p630_p0 = scmp.ne.s32.totalorder %s859_s1, %s629_s28  ;;  %s33_s25 = int_to_ptr.vmem [resolvable:$true] %s32_s25 }
   0x4   :  { %p633_p1 = scmp.lt.u32.totalorder %s629_s28, %s859_s1 }
   0x6   :  { %p635_p2 = pnand %p633_p1, %p630_p0 }
   0x8   :  { %638 = shalt.err (!%p635_p2)
}
   0x9   :  { %s639_s10 = scalar_lea.vmem %s33_s25, 512  ;;  %p644_p4 = scmp.lt.s32.totalorder %s33_s25, %s33_s25 }
   0xa   :  { %p640_p3 = scmp.ne.s32.totalorder %s33_s25, %s639_s10  ;;  %p645_p5 = scmp.lt.s32.totalorder %s639_s10, %s639_s10 }
   0xc   :  { %p646_p6 = por %p645_p5, %p644_p4 }
   0xe   :  { %p647_p7 = pnand %p646_p6, %p640_p3 }
  0x10   :  { %650 = shalt.err (!%p647_p7)
}
  0x11   :  { %s724_s11 = smov 64   ;;  %s725_s12 = smov 4  }
  0x12   :  { %38 = dma.hbm_to_vmem [thread:$0]  %s859_s1, 512, %s33_s25, [#allocation5], %s724_s11, %s724_s11, %s725_s12  }
  0x13   :  { %s726_s15 = smov [#allocation2]   ;;  %s651_s19 = scalar_lea.hbm %s858_s0, 512 }
  0x14   :  { %s20_s16 = sshll.u32 %s726_s15, 4  ;;  %p652_p8 = scmp.ne.s32.totalorder %s858_s0, %s651_s19  ;;  %s21_s16 = int_to_ptr.vmem [resolvable:$true] %s20_s16 }
  0x15   :  { %p655_p9 = scmp.lt.u32.totalorder %s651_s19, %s858_s0 }
  0x17   :  { %p657_p10 = pnand %p655_p9, %p652_p8 }
  0x19   :  { %660 = shalt.err (!%p657_p10)
}
  0x1a   :  { %s661_s24 = scalar_lea.vmem %s21_s16, 512  ;;  %p666_p12 = scmp.lt.s32.totalorder %s21_s16, %s21_s16 }
  0x1b   :  { %p662_p11 = scmp.ne.s32.totalorder %s21_s16, %s661_s24  ;;  %p667_p13 = scmp.lt.s32.totalorder %s661_s24, %s661_s24 }
  0x1d   :  { %p668_p0 = por %p667_p13, %p666_p12 }
  0x1f   :  { %p669_p1 = pnand %p668_p0, %p662_p11 }
  0x21   :  { %672 = shalt.err (!%p669_p1)
}
  0x22   :  { %s727_s1 = smov 128   ;;  %s728_s25 = smov 8  }
  0x23   :  { %26 = dma.hbm_to_vmem [thread:$0]  %s858_s0, 512, %s21_s16, [#allocation3], %s727_s1, %s727_s1, %s728_s25  }
  0x24   :  { %s729_s28 = smov [#allocation6]   ;;  %s730_s30 = smov [#allocation7]  }
  0x25   :  { %s46_s29 = sshll.u32 %s729_s28, 4  ;;  %s60_s8 = sshll.u32 %s730_s30, 4  ;;  %s47_s29 = int_to_ptr.vmem [resolvable:$true] %s46_s29  ;;  %s798_s8 = int_to_ptr.vmem [resolvable:$true] %s60_s8 }
  0x26   :  { %s673_s13 = scalar_lea.hbm %s861_s3, 1024 }
  0x27   :  { %p674_p2 = scmp.ne.s32.totalorder %s861_s3, %s673_s13  ;;  %p677_p3 = scmp.lt.u32.totalorder %s673_s13, %s861_s3 }
  0x29   :  { %p679_p4 = pnand %p677_p3, %p674_p2 }
  0x2b   :  { %682 = shalt.err (!%p679_p4)
}
  0x2c   :  { %s683_s0 = scalar_lea.vmem %s47_s29, 1024  ;;  %p688_p6 = scmp.lt.s32.totalorder %s47_s29, %s47_s29 }
  0x2d   :  { %p684_p5 = scmp.ne.s32.totalorder %s47_s29, %s683_s0  ;;  %p689_p7 = scmp.lt.s32.totalorder %s683_s0, %s683_s0 }
  0x2f   :  { %p690_p8 = por %p689_p7, %p688_p6 }
  0x31   :  { %p691_p9 = pnand %p690_p8, %p684_p5 }
  0x33   :  { %694 = shalt.err (!%p691_p9)
}
  0x34   :  { %52 = dma.hbm_to_vmem [thread:$0]  %s861_s3, 1024, %s47_s29, [#allocation5], %s724_s11, %s724_s11, %s725_s12  }
  0x35   :  { %s695_s22 = scalar_lea.hbm %s863_s5, 1024 }
  0x36   :  { %p696_p10 = scmp.ne.s32.totalorder %s863_s5, %s695_s22  ;;  %p699_p11 = scmp.lt.u32.totalorder %s695_s22, %s863_s5 }
  0x38   :  { %p701_p12 = pnand %p699_p11, %p696_p10 }
  0x3a   :  { %704 = shalt.err (!%p701_p12)
}
  0x3b   :  { %s705_s26 = scalar_lea.vmem %s798_s8, 1024  ;;  %p710_p0 = scmp.lt.s32.totalorder %s798_s8, %s798_s8 }
  0x3c   :  { %p706_p13 = scmp.ne.s32.totalorder %s798_s8, %s705_s26  ;;  %p711_p1 = scmp.lt.s32.totalorder %s705_s26, %s705_s26 }
  0x3e   :  { %p712_p2 = por %p711_p1, %p710_p0 }
  0x40   :  { %p713_p3 = pnand %p712_p2, %p706_p13 }
  0x42   :  { %716 = shalt.err (!%p713_p3)
}
  0x43   :  { %66 = dma.hbm_to_vmem [thread:$0]  %s863_s5, 1024, %s798_s8, [#allocation8], %s724_s11, %s724_s11, %s725_s12  }
  0x44   :  { %717 = dma.done.wait [#allocation3], 512  }
  0x45   :  { %718 = vsyncadd [#allocation3], 4294966784 }
  0x46   :  { %719 = dma.done.wait [#allocation5], 1536  }
  0x47   :  { %720 = vsyncadd [#allocation5], 4294965760 }
  0x48   :  { %721 = dma.done.wait [#allocation8], 1024  }
  0x49   :  { %722 = vsyncadd [#allocation8], 4294966272  ;;  %v593_v0 = vld [vmem:[#allocation4] sm:$0xff]   ;;  %v594_v1 = vld [vmem:[#allocation4 + $0x8] sm:$0xff]   ;;  %vm127_vm0 = vcmask 523264  }
  0x4a   :  { %533 = vmatprep.subr.bf16.mxu0 %v593_v0  ;;  %v595_v2 = vld [vmem:[#allocation4 + $0x10] sm:$0xff]   ;;  %v82_v3 = vld [vmem:[#allocation2] sm:$0xff]  ;;  %v83_v4 = vld [vmem:[#allocation2 + $0x8] sm:$0xff] }
  0x4b   :  { %534 = vmatpush3.bf16.msra.mxu0 %v593_v0  ;;  %v86_v5 = vpack.c.bf16 %v83_v4, %v82_v3  ;;  %v597_v6 = vld [vmem:[#allocation6] sm:$0xff]   ;;  %v598_v7 = vld [vmem:[#allocation6 + $0x8] sm:$0xff]   ;;  %v596_v8 = vld [vmem:[#allocation4 + $0x18] sm:$0xff]  }
  0x4c   :  { %535 = vmatprep.subr.bf16.mxu0 %v594_v1  ;;  %545 = vmatprep.subr.bf16.mxu1 %v597_v6  ;;  %v84_v9 = vld [vmem:[#allocation2 + $0x10] sm:$0xff]  ;;  %v85_v11 = vld [vmem:[#allocation2 + $0x18] sm:$0xff]  ;;  %v601_v14 = vld [vmem:[#allocation6 + $0x20] sm:$0xff]  }
  0x4d   :  { %541 = vmatprep.mubr.msk.bf16.mxu0 %vm127_vm0, %v86_v5  ;;  %546 = vmatpush3.bf16.msra.mxu1 %v597_v6  ;;  %v599_v10 = vld [vmem:[#allocation6 + $0x10] sm:$0xff]   ;;  %v600_v12 = vld [vmem:[#allocation6 + $0x18] sm:$0xff]   ;;  %v87_v13 = vpack.c.bf16 %v85_v11, %v84_v9  ;;  %v602_v15 = vld [vmem:[#allocation6 + $0x28] sm:$0xff]  }
  0x4e   :  { %547 = vmatprep.subr.bf16.mxu1 %v598_v7  ;;  %v603_v16 = vld [vmem:[#allocation6 + $0x30] sm:$0xff]   ;;  %v604_v17 = vld [vmem:[#allocation6 + $0x38] sm:$0xff]   ;;  %v605_v18 = vld [vmem:[#allocation7] sm:$0xff]  }
  0x4f   :  { %536 = vmatpush3.bf16.msra.mxu0 %v594_v1  ;;  %v606_v19 = vld [vmem:[#allocation7 + $0x8] sm:$0xff]   ;;  %v607_v20 = vld [vmem:[#allocation7 + $0x10] sm:$0xff]   ;;  %v608_v21 = vld [vmem:[#allocation7 + $0x18] sm:$0xff]  }
  0x50   :  { %537 = vmatprep.subr.bf16.mxu0 %v595_v2  ;;  %v609_v22 = vld [vmem:[#allocation7 + $0x20] sm:$0xff]   ;;  %v610_v23 = vld [vmem:[#allocation7 + $0x28] sm:$0xff]   ;;  %v611_v39 = vld [vmem:[#allocation7 + $0x30] sm:$0xff]  }
  0x51   :  { %548 = vmatpush3.bf16.msra.mxu1 %v598_v7  ;;  %v482_v24 = vld [vmem:[%s860_s2] ss:$0 sm:$0xff]  ;;  %v612_v40 = vld [vmem:[#allocation7 + $0x38] sm:$0xff]  }
  0x52   :  { %549 = vmatprep.subr.bf16.mxu1 %v599_v10  ;;  %v489_v41 = vld [vmem:[%s862_s4] ss:$0 sm:$0xff] }
  0x53   :  { %538 = vmatpush3.bf16.msra.mxu0 %v595_v2  ;;  %v498_v56 = vld [vmem:[%s864_s6] ss:$0 sm:$0xff] }
  0x54   :  { %539 = vmatprep.subr.bf16.mxu0 %v596_v8 }
  0x55   :  { %550 = vmatpush3.bf16.msra.mxu1 %v599_v10 }
  0x56   :  { %551 = vmatprep.subr.bf16.mxu1 %v600_v12 }
  0x57   :  { %540 = vmatpush3.bf16.msra.mxu0 %v596_v8 }
  0x58   :  { %565 = vmatprep.subr.bf16.mxu0 %v605_v18 }
  0x59   :  { %552 = vmatpush3.bf16.msra.mxu1 %v600_v12 }
  0x5a   :  { %542 = vmatmul.mubr.msk.bf16.vlgmr.msra.gmra.mrb[0].mxu0 %vm127_vm0, %v87_v13  ;;  %553 = vmatprep.subr.bf16.mxu1 %v601_v14 }
  0x5b   :  { %566 = vmatpush3.bf16.msra.mxu0 %v605_v18 }
  0x5c   :  { %567 = vmatprep.subr.bf16.mxu0 %v606_v19 }
  0x5d   :  { %554 = vmatpush3.bf16.msra.mxu1 %v601_v14 }
  0x5e   :  { %555 = vmatprep.subr.bf16.mxu1 %v602_v15 }
  0x5f   :  { %568 = vmatpush3.bf16.msra.mxu0 %v606_v19 }
  0x60   :  { %569 = vmatprep.subr.bf16.mxu0 %v607_v20 }
  0x61   :  { %556 = vmatpush3.bf16.msra.mxu1 %v602_v15 }
  0x62   :  { %557 = vmatprep.subr.bf16.mxu1 %v603_v16 }
  0x63   :  { %570 = vmatpush3.bf16.msra.mxu0 %v607_v20 }
  0x64   :  { %571 = vmatprep.subr.bf16.mxu0 %v608_v21 }
  0x65   :  { %558 = vmatpush3.bf16.msra.mxu1 %v603_v16 }
  0x66   :  { %559 = vmatprep.subr.bf16.mxu1 %v604_v17 }
  0x67   :  { %572 = vmatpush3.bf16.msra.mxu0 %v608_v21 }
  0x68   :  { %573 = vmatprep.subr.bf16.mxu0 %v609_v22 }
  0x69   :  { %560 = vmatpush3.bf16.msra.mxu1 %v604_v17 }
  0x6b   :  { %574 = vmatpush3.bf16.msra.mxu0 %v609_v22 }
  0x6c   :  { %575 = vmatprep.subr.bf16.mxu0 %v610_v23 }
  0x6f   :  { %576 = vmatpush3.bf16.msra.mxu0 %v610_v23 }
  0x70   :  { %577 = vmatprep.subr.bf16.mxu0 %v611_v39 }
  0x73   :  { %578 = vmatpush3.bf16.msra.mxu0 %v611_v39 }
  0x74   :  { %579 = vmatprep.subr.bf16.mxu0 %v612_v40 }
  0x77   :  { %580 = vmatpush3.bf16.msra.mxu0 %v612_v40 }
 0x12d   :  { %v543_v25 = vpop.f32.mrb[0].mxu0 }
 0x12e   :  { %v177_v26 = vadd.f32 %v543_v25, %v482_v24  ;;  %v168_v27 = vpop.f32.mrb[1].mxu0 }
 0x12f   :  { %v169_v28 = vadd.f32 %v482_v24, %v168_v27  ;;  %v544_v29 = vpop.f32.mrb[2].mxu0 }
 0x130   :  { %v180_v30 = vadd.f32 %v544_v29, %v482_v24  ;;  %v171_v31 = vpop.f32.mrb[3].mxu0  ;;  %v185_v33 = vmax.f32 %v177_v26, 0.0 }
 0x131   :  { %v172_v32 = vadd.f32 %v482_v24, %v171_v31  ;;  %v183_v35 = vmax.f32 %v169_v28, 0.0 }
 0x132   :  { %v186_v34 = vmax.f32 %v180_v30, 0.0 }
 0x133   :  { %v184_v36 = vmax.f32 %v172_v32, 0.0 }
 0x134   :  { %v188_v37 = vpack.c.bf16 %v186_v34, %v185_v33 }
 0x135   :  { %v187_v38 = vpack.c.bf16 %v184_v36, %v183_v35 }
 0x137   :  { %561 = vmatprep.mubr.bf16.mxu1 %v187_v38 }
 0x138   :  { %562 = vmatmul.mubr.bf16.vlgmr.msra.gmra.mrb[0].mxu1 %v188_v37 }
 0x20b   :  { %v563_v42 = vpop.f32.mrb[0].mxu1 }
 0x20c   :  { %v303_v43 = vadd.f32 %v563_v42, %v489_v41  ;;  %v294_v44 = vpop.f32.mrb[1].mxu1 }
 0x20d   :  { %v295_v45 = vadd.f32 %v489_v41, %v294_v44  ;;  %v564_v46 = vpop.f32.mrb[2].mxu1 }
 0x20e   :  { %v306_v47 = vadd.f32 %v564_v46, %v489_v41  ;;  %v297_v48 = vpop.f32.mrb[3].mxu1  ;;  %v311_v50 = vmax.f32 %v303_v43, 0.0 }
 0x20f   :  { %v298_v49 = vadd.f32 %v489_v41, %v297_v48  ;;  %v309_v52 = vmax.f32 %v295_v45, 0.0 }
 0x210   :  { %v312_v51 = vmax.f32 %v306_v47, 0.0 }
 0x211   :  { %v310_v53 = vmax.f32 %v298_v49, 0.0 }
 0x212   :  { %v314_v54 = vpack.c.bf16 %v312_v51, %v311_v50 }
 0x213   :  { %v313_v55 = vpack.c.bf16 %v310_v53, %v309_v52 }
 0x215   :  { %581 = vmatprep.mubr.bf16.mxu0 %v313_v55 }
 0x216   :  { %582 = vmatmul.mubr.bf16.vlgmr.msra.gmra.mrb[4].mxu0 %v314_v54 }
 0x2e9   :  { %v583_v57 = vpop.f32.mrb[4].mxu0 }
 0x2ea   :  { %v429_v58 = vadd.f32 %v583_v57, %v498_v56  ;;  %v420_v59 = vpop.f32.mrb[5].mxu0 }
 0x2eb   :  { %v421_v60 = vadd.f32 %v498_v56, %v420_v59  ;;  %v584_v61 = vpop.f32.mrb[6].mxu0 }
 0x2ec   :  { %439 = vmax.xlane.f32.xlu1 %v429_v58  ;;  %v423_v62 = vpop.f32.mrb[7].mxu0  ;;  %v432_v63 = vadd.f32 %v584_v61, %v498_v56 }
 0x2ed   :  { %435 = vmax.xlane.f32.xlu0 %v421_v60  ;;  %v424_v0 = vadd.f32 %v498_v56, %v423_v62 }
 0x2f0   :  { %441 = vmax.xlane.f32.xlu1 %v432_v63 }
 0x2f1   :  { %437 = vmax.xlane.f32.xlu0 %v424_v0 }
 0x379   :  { %v440_v1 = vpop.xlane.xlu1 %439 }
 0x37a   :  { %v445_v2 = vsub.f32 %v429_v58, %v440_v1  ;;  %v436_v3 = vpop.xlane.xlu0 %435 }
 0x37b   :  { %v443_v4 = vsub.f32 %v421_v60, %v436_v3 }
 0x37c   :  { %v451_v7 = vmul.f32 1.442695, %v445_v2 }
 0x37d   :  { %v447_v5 = vmul.f32 1.442695, %v443_v4  ;;  %v442_v6 = vpop.xlane.xlu1 %441 }
 0x37e   :  { %v438_v8 = vpop.xlane.xlu0 %437  ;;  %v446_v9 = vsub.f32 %v432_v63, %v442_v6 }
 0x37f   :  { %613 = vpow2.f32 %v447_v5  ;;  %v444_v10 = vsub.f32 %v424_v0, %v438_v8 }
 0x380   :  { %615 = vpow2.f32 %v451_v7  ;;  %v453_v12 = vmul.f32 1.442695, %v446_v9 }
 0x381   :  { %v449_v11 = vmul.f32 1.442695, %v444_v10 }
 0x383   :  { %617 = vpow2.f32 %v449_v11 }
 0x384   :  { %619 = vpow2.f32 %v453_v12 }
 0x389   :  { %v614_v13 = vpop.eup %613 }
 0x38a   :  { %455 = vadd.xlane.f32.xlu0 %v614_v13  ;;  %v616_v14 = vpop.eup %615 }
 0x38d   :  { %v618_v15 = vpop.eup %617 }
 0x38e   :  { %459 = vadd.xlane.f32.xlu0 %v616_v14  ;;  %457 = vadd.xlane.f32.xlu1 %v618_v15  ;;  %v620_v16 = vpop.eup %619 }
 0x392   :  { %461 = vadd.xlane.f32.xlu1 %v620_v16 }
 0x417   :  { %v456_v17 = vpop.xlane.xlu0 %455 }
 0x418   :  { %621 = vrcp.f32 %v456_v17 }
 0x41b   :  { %v458_v18 = vpop.xlane.xlu1 %457  ;;  %v460_v19 = vpop.xlane.xlu0 %459 }
 0x41c   :  { %623 = vrcp.f32 %v458_v18 }
 0x41d   :  { %625 = vrcp.f32 %v460_v19 }
 0x41f   :  { %v462_v20 = vpop.xlane.xlu1 %461 }
 0x420   :  { %627 = vrcp.f32 %v462_v20 }
 0x422   :  { %v622_v21 = vpop.eup %621 }
 0x423   :  { %v467_v22 = vmul.f32 %v622_v21, %v614_v13 }
 0x425   :  { %471 = vst [vmem:[%s865_s7] sm:$0xff] %v467_v22 }
 0x426   :  { %v624_v23 = vpop.eup %623 }
 0x427   :  { %v626_v24 = vpop.eup %625  ;;  %v468_v25 = vmul.f32 %v624_v23, %v618_v15 }
 0x428   :  { %v469_v26 = vmul.f32 %v626_v24, %v616_v14 }
 0x429   :  { %472 = vst [vmem:[%s865_s7 + $0x8] sm:$0xff] %v468_v25 }
 0x42a   :  { %v628_v27 = vpop.eup %627  ;;  %473 = vst [vmem:[%s865_s7 + $0x10] sm:$0xff] %v469_v26 }
 0x42b   :  { %v470_v28 = vmul.f32 %v628_v27, %v620_v16 }
 0x42d   :  { %474 = vst [vmem:[%s865_s7 + $0x18] sm:$0xff] %v470_v28 }
 0x42e   :  { %479 = vsyncpa [#allocation3], 1 }
 0x42f   :  { %480 = vsyncpa [#allocation5], 1 }
 0x430   :  { %481 = vsyncpa [#allocation8], 1 }

</bundles_post_ra>
